<compile_context>
chip_gen: v6e
topology: v6e:2x2x1
jax: 0.10.0
libtpu: 0.0.40
codegen_flags: <defaults>
</compile_context>

<pallas_src>
import math

import jax
import jax.numpy as jnp
from jax.experimental import pallas as pl
from jax.experimental.pallas import tpu as pltpu

_LANE = 128
_SUBLANE = 8


def _round_up(x: int, m: int) -> int:
    return (x + m - 1) // m * m


def _pad2(a, rows, cols):
    r, c = a.shape
    if r == rows and c == cols:
        return a
    return jnp.pad(a, ((0, rows - r), (0, cols - c)))


def _vmem_budget_bytes() -> int:
    """~75% of physical VMEM, capped at 100 MiB (~48 MiB on v7x, ~96-100 MiB on v5e/v6e)."""
    cap = 64 * 1024 * 1024  # conservative fallback (v7x-sized) works on every generation
    try:
        info = pltpu.get_tpu_info()
        cap = int(getattr(info, "vmem_capacity_bytes", cap)) or cap
    except Exception:
        pass
    return int(min(0.75 * cap, 100 * 1024 * 1024))


def _tile_vmem_bytes(tm: int, tf: int, dp: int) -> int:
    """Double-buffered input tiles + resident f32 output block."""
    bf16, f32 = 2, 4
    return (2 * tm * dp * bf16          # x tile
            + 2 * dp * tf * bf16        # w1 tile
            + 2 * _SUBLANE * tf * f32   # b1 tile (sublane-padded)
            + 2 * tf * dp * bf16        # w2 tile
            + 2 * _SUBLANE * dp * f32   # b2
            + 2 * tm * dp * f32)        # output block (f32, resident across the f axis)


def _select_tiles(np_rows, fp, dp, budget, max_tm=None, max_tf=None):
    """Pick (tm, tf): tm first (weight HBM traffic scales as Np/tm), then largest tf."""
    tf_cands = [t for t in (8192, 4096, 2048, 1024, 512, 256, 128)
                if t <= fp and fp % t == 0 and (max_tf is None or t <= max_tf)]
    if not tf_cands:
        tf_cands = [min(fp, _LANE)]

    # Keep >= 2 row blocks whenever possible so a parallel grid axis with extent >= 2
    # exists for v7x's two TensorCores (v5e/v6e single-TC are unaffected).
    tm_cap = _round_up(np_rows // 2, _SUBLANE) if np_rows >= 2 * _SUBLANE else np_rows
    if max_tm is not None:
        tm_cap = min(tm_cap, max_tm)
    tm_cands = [t for t in (2048, 1024, 512, 256, 128, 64, 32, 16, 8) if t <= tm_cap]
    if not tm_cands:
        tm_cands = [max(_SUBLANE, _round_up(tm_cap, _SUBLANE))]

    tf_floor = min(256, tf_cands[0])
    for floor in (tf_floor, tf_cands[-1]):  # insist on a decent tf first, then relax
        for tm in tm_cands:
            for tf in tf_cands:
                if tf < floor:
                    break
                if _tile_vmem_bytes(tm, tf, dp) <= budget:
                    return tm, tf
    return tm_cands[-1], tf_cands[-1]       # tiny fallback (may exceed budget)


def _ffn_kernel(x_ref, w1_ref, b1_ref, w2_ref, b2_ref, o_ref):
    f = pl.program_id(1)

    @pl.when(f == 0)
    def _():
        o_ref[...] = jnp.zeros_like(o_ref)

    # First matmul on the MXU: bf16 inputs, f32 accumulation; bias + ReLU on the VPU.
    h = jnp.dot(x_ref[...], w1_ref[...], preferred_element_type=jnp.float32)
    h = jnp.maximum(h + b1_ref[...], 0.0)

    # Partial second matmul for this d_ff tile, accumulated straight into the resident
    # f32 output block (out index_map (i, 0) keeps it in VMEM across the f axis).
    o_ref[...] += jnp.dot(h.astype(jnp.bfloat16), w2_ref[...],
                          preferred_element_type=jnp.float32)

    @pl.when(f == pl.num_programs(1) - 1)
    def _():
        o_ref[...] += b2_ref[...]


class PallasPositionwiseFeedForward:
    """Pallas-TPU PositionwiseFeedForward: y = w2(relu(w1(x))).

    Weights are stored pre-transposed as (in, out) == torch Linear W.T. Padding to
    lane-dense tiles and the bf16 cast of the matmul operands happen ONCE here and are
    cached, instead of re-streaming all weight bytes through HBM on every call.
    """

    def __init__(self, w1, b1, w2, b2, *, max_block_rows=None, max_block_ff=None):
        d_model, d_ff = w1.shape
        assert w2.shape == (d_ff, d_model)
        self.d_model, self.d_ff = d_model, d_ff
        self.dp = _round_up(d_model, _LANE)
        self.fp = _round_up(d_ff, _LANE)
        # Cached, pre-padded bf16 weights (biases stay f32 for exact bias/ReLU).
        self.w1 = _pad2(jnp.asarray(w1), self.dp, self.fp).astype(jnp.bfloat16)
        self.w2 = _pad2(jnp.asarray(w2), self.fp, self.dp).astype(jnp.bfloat16)
        self.b1 = _pad2(jnp.asarray(b1).reshape(1, d_ff), 1, self.fp).astype(jnp.float32)
        self.b2 = _pad2(jnp.asarray(b2).reshape(1, d_model), 1, self.dp).astype(jnp.float32)
        self.max_block_rows = max_block_rows
        self.max_block_ff = max_block_ff
        self.vmem_budget = _vmem_budget_bytes()

    def __call__(self, x):
        orig_shape = x.shape
        d, dp, fp = self.d_model, self.dp, self.fp
        assert orig_shape[-1] == d
        n = math.prod(orig_shape[:-1]) if len(orig_shape) > 1 else 1

        tm, tf = _select_tiles(_round_up(n, _SUBLANE), fp, dp, self.vmem_budget,
                               self.max_block_rows, self.max_block_ff)
        np_rows = _round_up(_round_up(n, _SUBLANE), tm)

        # Zero padding is exact: padded x cols hit zero w1 rows; padded w2 rows are zero;
        # padded output rows/cols are sliced off below.
        x2 = _pad2(x.reshape(n, d), np_rows, dp).astype(jnp.bfloat16)

        grid = (np_rows // tm, fp // tf)
        est = _tile_vmem_bytes(tm, tf, dp)
        vmem_limit = int(min(max(int(1.5 * est), 16 * 1024 * 1024), self.vmem_budget))

        weight_bytes = (self.w1.size * 2 + self.w2.size * 2
                        + self.b1.size * 4 + self.b2.size * 4)
        cost = pl.CostEstimate(
            flops=4 * np_rows * dp * fp,            # two matmuls, 2*M*N*K each
            transcendentals=0,
            bytes_accessed=int(x2.size * 2 + grid[0] * weight_bytes + np_rows * dp * 4),
        )

        out = pl.pallas_call(
            _ffn_kernel,
            out_shape=jax.ShapeDtypeStruct((np_rows, dp), jnp.float32),
            grid_spec=pltpu.PrefetchScalarGridSpec(
                num_scalar_prefetch=0,
                grid=grid,
                in_specs=[
                    pl.BlockSpec((tm, dp), lambda i, f: (i, 0)),   # x row block
                    pl.BlockSpec((dp, tf), lambda i, f: (0, f)),   # w1 tile over d_ff
                    pl.BlockSpec((1, tf), lambda i, f: (0, f)),    # b1 tile over d_ff
                    pl.BlockSpec((tf, dp), lambda i, f: (f, 0)),   # w2 tile over d_ff
                    pl.BlockSpec((1, dp), lambda i, f: (0, 0)),    # b2 (constant)
                ],
                out_specs=pl.BlockSpec((tm, dp), lambda i, f: (i, 0)),
            ),
            compiler_params=pltpu.CompilerParams(
                dimension_semantics=("parallel", "arbitrary"),  # rows independent, d_ff reduction
                vmem_limit_bytes=vmem_limit,
            ),
            cost_estimate=cost,
        )(x2, self.w1, self.b1, self.w2, self.b2)

        return out[:n, :d].reshape(orig_shape)


if __name__ == "__main__":
    B, S, D, F = 2, 8, 64, 256

    key = jax.random.PRNGKey(0)
    kx, k1, k2, k3, k4 = jax.random.split(key, 5)
    x = jax.random.normal(kx, (B, S, D), jnp.float32)

    # Weights stored as (in, out) == torch W.T ; biases as (out,).
    w1 = 0.1 * jax.random.normal(k1, (D, F), jnp.float32)
    b1 = 0.1 * jax.random.normal(k2, (F,), jnp.float32)
    w2 = 0.1 * jax.random.normal(k3, (F, D), jnp.float32)
    b2 = 0.1 * jax.random.normal(k4, (D,), jnp.float32)

    # Small max_block_ff forces >1 step on the d_ff reduction axis so the
    # accumulate-into-output path is exercised even at toy sizes.
    ffn = PallasPositionwiseFeedForward(w1, b1, w2, b2, max_block_ff=128)

    out = jax.block_until_ready(ffn(x))

    # Pure-JAX f32 reference (kernel uses bf16 matmul operands -> loose tolerance).
    ref = (jnp.maximum(x.reshape(-1, D) @ w1 + b1.reshape(1, F), 0.0) @ w2
           + b2.reshape(1, D)).reshape(B, S, D)

    assert out.shape == (B, S, D)
    assert bool(jnp.all(jnp.isfinite(out)))
    err = float(jnp.max(jnp.abs(out - ref)))
    assert bool(jnp.allclose(out, ref, rtol=5e-2, atol=5e-2)), err
    print("KERNEL_OK")
</pallas_src>

<mosaic_0001>
module attributes {stable_mosaic.version = 11 : i64} {
  func.func @_ffn_kernel(%arg0: i32, %arg1: i32, %arg2: memref<8x128xbf16, #tpu.memory_space<vmem>>, %arg3: memref<128x128xbf16, #tpu.memory_space<vmem>>, %arg4: memref<1x128xf32, #tpu.memory_space<vmem>>, %arg5: memref<128x128xbf16, #tpu.memory_space<vmem>>, %arg6: memref<1x128xf32, #tpu.memory_space<vmem>>, %arg7: memref<8x128xf32, #tpu.memory_space<vmem>>) attributes {dimension_semantics = [#tpu.dimension_semantics<parallel>, #tpu.dimension_semantics<arbitrary>], iteration_bounds = array<i64: 2, 2>, scalar_prefetch = 0 : i64, scratch_operands = 0 : i64, tpu.core_type = #tpu.core_type<tc>, window_params = [{transform_indices = @transform_0, window_bounds = array<i64: 8, 128>}, {transform_indices = @transform_1, window_bounds = array<i64: 128, 128>}, {transform_indices = @transform_2, window_bounds = array<i64: 1, 128>}, {transform_indices = @transform_3, window_bounds = array<i64: 128, 128>}, {pipeline_mode = #tpu.pipeline_mode<synchronous>, transform_indices = @transform_4, window_bounds = array<i64: 1, 128>}, {transform_indices = @transform_5, window_bounds = array<i64: 8, 128>}]} {
    %c0_i32 = arith.constant 0 : i32
    %0 = arith.cmpi eq, %arg1, %c0_i32 : i32
    %1 = arith.extui %0 : i1 to i32
    %c0_i32_0 = arith.constant 0 : i32
    %2 = arith.cmpi ne, %1, %c0_i32_0 : i32
    scf.if %2 {
      %cst_15 = arith.constant 0.000000e+00 : f32
      %20 = vector.broadcast %cst_15 : f32 to vector<8x128xf32>
      %c0_16 = arith.constant 0 : index
      %c0_17 = arith.constant 0 : index
      %21 = vector.load %arg7[%c0_16, %c0_17] : memref<8x128xf32, #tpu.memory_space<vmem>>, vector<8x128xf32>
      tpu.vector_store %arg7[%c0_16, %c0_17], %20 {strides = array<i32>} : memref<8x128xf32, #tpu.memory_space<vmem>>, vector<8x128xf32>,
    } else {
    }
    %c0 = arith.constant 0 : index
    %c0_1 = arith.constant 0 : index
    %3 = vector.load %arg2[%c0, %c0_1] : memref<8x128xbf16, #tpu.memory_space<vmem>>, vector<8x128xbf16>
    %c0_2 = arith.constant 0 : index
    %c0_3 = arith.constant 0 : index
    %4 = vector.load %arg3[%c0_2, %c0_3] : memref<128x128xbf16, #tpu.memory_space<vmem>>, vector<128x128xbf16>
    %cst = arith.constant dense<0.000000e+00> : vector<8x128xf32>
    %5 = tpu.matmul %3, %4, %cst {dimension_numbers = #tpu.dot_dimension_numbers<[1], [0], [0], [1], [0, 0, 1, 1], [], []>} : vector<8x128xbf16>, vector<128x128xbf16>, vector<8x128xf32> -> vector<8x128xf32>
    %c0_4 = arith.constant 0 : index
    %c0_5 = arith.constant 0 : index
    %6 = vector.load %arg4[%c0_4, %c0_5] : memref<1x128xf32, #tpu.memory_space<vmem>>, vector<1x128xf32>
    %7 = vector.broadcast %6 : vector<1x128xf32> to vector<8x128xf32>
    %8 = arith.addf %5, %7 : vector<8x128xf32>
    %cst_6 = arith.constant 0.000000e+00 : f32
    %9 = vector.broadcast %cst_6 : f32 to vector<8x128xf32>
    %10 = arith.maximumf %8, %9 : vector<8x128xf32>
    %c0_7 = arith.constant 0 : index
    %c0_8 = arith.constant 0 : index
    %11 = vector.load %arg7[%c0_7, %c0_8] : memref<8x128xf32, #tpu.memory_space<vmem>>, vector<8x128xf32>
    %12 = arith.truncf %10 : vector<8x128xf32> to vector<8x128xbf16>
    %c0_9 = arith.constant 0 : index
    %c0_10 = arith.constant 0 : index
    %13 = vector.load %arg5[%c0_9, %c0_10] : memref<128x128xbf16, #tpu.memory_space<vmem>>, vector<128x128xbf16>
    %cst_11 = arith.constant dense<0.000000e+00> : vector<8x128xf32>
    %14 = tpu.matmul %12, %13, %cst_11 {dimension_numbers = #tpu.dot_dimension_numbers<[1], [0], [0], [1], [0, 0, 1, 1], [], []>} : vector<8x128xbf16>, vector<128x128xbf16>, vector<8x128xf32> -> vector<8x128xf32>
    %15 = arith.addf %11, %14 : vector<8x128xf32>
    %c0_12 = arith.constant 0 : index
    %c0_13 = arith.constant 0 : index
    %16 = vector.load %arg7[%c0_12, %c0_13] : memref<8x128xf32, #tpu.memory_space<vmem>>, vector<8x128xf32>
    tpu.vector_store %arg7[%c0_12, %c0_13], %15 {strides = array<i32>} : memref<8x128xf32, #tpu.memory_space<vmem>>, vector<8x128xf32>,
    %c1_i32 = arith.constant 1 : i32
    %17 = arith.cmpi eq, %arg1, %c1_i32 : i32
    %18 = arith.extui %17 : i1 to i32
    %c0_i32_14 = arith.constant 0 : i32
    %19 = arith.cmpi ne, %18, %c0_i32_14 : i32
    scf.if %19 {
      %c0_15 = arith.constant 0 : index
      %c0_16 = arith.constant 0 : index
      %20 = vector.load %arg7[%c0_15, %c0_16] : memref<8x128xf32, #tpu.memory_space<vmem>>, vector<8x128xf32>
      %c0_17 = arith.constant 0 : index
      %c0_18 = arith.constant 0 : index
      %21 = vector.load %arg6[%c0_17, %c0_18] : memref<1x128xf32, #tpu.memory_space<vmem>>, vector<1x128xf32>
      %22 = vector.broadcast %21 : vector<1x128xf32> to vector<8x128xf32>
      %23 = arith.addf %20, %22 : vector<8x128xf32>
      %c0_19 = arith.constant 0 : index
      %c0_20 = arith.constant 0 : index
      %24 = vector.load %arg7[%c0_19, %c0_20] : memref<8x128xf32, #tpu.memory_space<vmem>>, vector<8x128xf32>
      tpu.vector_store %arg7[%c0_19, %c0_20], %23 {strides = array<i32>} : memref<8x128xf32, #tpu.memory_space<vmem>>, vector<8x128xf32>,
    } else {
    }
    return
  }
  func.func @transform_0(%arg0: i32, %arg1: i32) -> (i32, i32) {
    %c0_i32 = arith.constant 0 : i32
    %c0_i32_0 = arith.constant 0 : i32
    return %arg0, %c0_i32 : i32, i32
  }
  func.func @transform_1(%arg0: i32, %arg1: i32) -> (i32, i32) {
    %c0_i32 = arith.constant 0 : i32
    %c0_i32_0 = arith.constant 0 : i32
    return %c0_i32, %arg1 : i32, i32
  }
  func.func @transform_2(%arg0: i32, %arg1: i32) -> (i32, i32) {
    %c0_i32 = arith.constant 0 : i32
    %c0_i32_0 = arith.constant 0 : i32
    return %c0_i32, %arg1 : i32, i32
  }
  func.func @transform_3(%arg0: i32, %arg1: i32) -> (i32, i32) {
    %c0_i32 = arith.constant 0 : i32
    %c0_i32_0 = arith.constant 0 : i32
    return %arg1, %c0_i32 : i32, i32
  }
  func.func @transform_4(%arg0: i32, %arg1: i32) -> (i32, i32) {
    %c0_i32 = arith.constant 0 : i32
    %c0_i32_0 = arith.constant 0 : i32
    %c0_i32_1 = arith.constant 0 : i32
    return %c0_i32, %c0_i32_0 : i32, i32
  }
  func.func @transform_5(%arg0: i32, %arg1: i32) -> (i32, i32) {
    %c0_i32 = arith.constant 0 : i32
    %c0_i32_0 = arith.constant 0 : i32
    return %arg0, %c0_i32 : i32, i32
  }
}

</mosaic_0001>

<bundles_post_ra>
// kernel: tpu_custom_call.1
= control target key start
LH: loop header
LB: loop body
LE: loop exit
PB: predicated region body
PF: predicated region fallthrough
CT: control target
= control target key end

     0   :  { %s1527_s0 = inlined_call_operand.hbm [shape: bf16[16,128], index: 0, kind: input, shape index: {}]   ;;  %s1528_s1 = inlined_call_operand.hbm [shape: bf16[128,256], index: 1, kind: input, shape index: {}]   ;;  %s1529_s2 = inlined_call_operand.vmem [shape: f32[1,256], index: 2, kind: input, shape index: {}]   ;;  %s1530_s3 = inlined_call_operand.hbm [shape: bf16[256,128], index: 3, kind: input, shape index: {}]   ;;  %s1531_s4 = inlined_call_operand.vmem [shape: f32[1,128], index: 4, kind: input, shape index: {}]   ;;  %s1532_s5 = inlined_call_operand.hbm [shape: f32[16,128], index: 5, kind: output, shape index: {}]  }
   0x1   :  { %1542 = sst [smem:[#allocation19_spill]] %s1527_s0 }
   0x2   :  { %1543 = sst [smem:[#allocation20_spill]] %s1528_s1 }
   0x3   :  { %1544 = sst [smem:[#allocation21_spill]] %s1529_s2 }
   0x4   :  { %1545 = sst [smem:[#allocation22_spill]] %s1531_s4 }
   0x5   :  { %1546 = sst [smem:[#allocation23_spill]] %s1532_s5 }
   0x6   :  { %10 = vsyncpa [#allocation3], 0 }
   0x7   :  { %12 = vsyncpa [#allocation3 + $0x1], 0 }
   0x8   :  { %13 = vsyncpa [#allocation6], 0 }
   0x9   :  { %15 = vsyncpa [#allocation6 + $0x1], 0 }
   0xa   :  { %16 = vsyncpa [#allocation4], 0 }
   0xb   :  { %18 = vsyncpa [#allocation4 + $0x1], 0  ;;  %s1214_s18 = smov 0   ;;  %s1216_s19 = smov 0  }
   0xc   :  { %s1218_s20 = smov 0   ;;  %s1220_s21 = smov 0  }
   0xd   :  { %s1222_s22 = smov 0   ;;  %s1224_s23 = smov 0  }
   0xe   :  { %s1226_s24 = smov 0   ;;  %s1228_s25 = smov 0  }
   0xf   :  { %s1230_s26 = smov 0   ;;  %s1232_s27 = smov 0  }
  0x10   :  { %s1234_s28 = smov 0  }
  0x11 LB: > { %1547 = sst [smem:[#allocation12_spill]] %s1152_s23  ;;  %p51_p0 = scmp.eq.s32.totalorder %s1172_s28, 0  ;;  %s1172_s28 = sphi %s1234_s28, %s24_s28   ;;  %s1168_s27 = sphi %s1232_s27, %s1581_s27   ;;  %s1164_s26 = sphi %s1230_s26, %s1588_s26   ;;  %s1160_s25 = sphi %s1228_s25, %s1579_s25   ;;  %s1156_s24 = sphi %s1226_s24, %s1587_s24   ;;  %s1152_s23 = sphi %s1224_s23, %s1578_s23   ;;  %s1148_s22 = sphi %s1222_s22, %s1586_s22   ;;  %s1144_s21 = sphi %s1220_s21, %s1585_s21   ;;  %s1140_s20 = sphi %s1218_s20, %s1584_s20   ;;  %s1136_s19 = sphi %s1216_s19, %s1583_s19   ;;  %s1132_s18 = sphi %s1214_s18, %s1582_s18  }
  0x12   : > { %1548 = sst [smem:[#allocation13_spill]] %s1160_s25  ;;  %p76_p1 = scmp.ne.s32.totalorder %s1140_s20, %s1136_s19 }
  0x13   : > { %1549 = sst [smem:[#allocation14_spill]] %s1168_s27  ;;  %p1538_p2 = scmp.lt.s32.totalorder %s1172_s28, 4 }
  0x14   : > { %s226_s30 = sand.u32 1, %s1172_s28   ;;  %p78_p3 = por %p76_p1, %p51_p0 }
  0x15   : > { %s228_s6 = sand.u32 1, %s1140_s20   ;;  %s738_s7 = sshll.u32 %s1164_s26, 6 }
  0x16   : > { %s1279_s8 = sshll.u32 %s228_s6, 6  ;;  %s1550_s1 = sld [smem:[#allocation20_spill]] }
  0x17   : > { %p1286_p4 = pnand %p1538_p2, %p78_p3  ;;  %s230_s13 = scalar_lea.vmem [#allocation5], %s1279_s8 }
  0x18   : > { %s236_s14 = sshll.u32 %s230_s13, 4  ;;  %s1291_s15 = scalar_lea.sflag [#allocation6], %s226_s30  ;;  %s237_s14 = int_to_ptr.vmem [resolvable:$true] %s236_s14 }
  0x19   : > { %p1535_p5 = pneg %p1286_p4  ;;  %s977_s16 = scalar_lea.vmem %s237_s14, 1024 }
  0x1a   : > { %p978_p6 = scmp.ne.s32.totalorder %s237_s14, %s977_s16  ;;  %s1174_s17 = smov [#allocation5]  }
  0x1b   : > { %s982_s6 = sshll.u32 %s1174_s17, 4  ;;  %s983_s6 = int_to_ptr.vmem [resolvable:$false] %s982_s6 }
  0x1c   : > { %s235_s11 = scalar_lea.hbm %s1550_s1, %s738_s7  ;;  %p980_p7 = pnand %p978_p6, %p1535_p5 }
  0x1d   : > { %s984_s7 = scalar_lea.vmem %s983_s6, 2048  ;;  %p985_p9 = scmp.lt.s32.totalorder %s237_s14, %s983_s6 }
  0x1e   : > { %p981_p8 = pneg %p980_p7  ;;  %p986_p10 = scmp.lt.s32.totalorder %s984_s7, %s977_s16 }
  0x20   : > { %p987_p11 = por %p986_p10, %p985_p9 }
  0x22   : > { %p988_p12 = pnand %p987_p11, %p981_p8 }
  0x24   : > { %991 = shalt.err (!%p988_p12)
}
  0x25   : > { %s1175_s9 = smov 128   ;;  %s1533_s30 = smov 64  }
  0x26   : > { %s1534_s10 = smov 4   ;;  %p742_p13 = scmp.ge.s32.totalorder %s1172_s28, 1 }
  0x27   : > { %844 = dma.hbm_to_vmem [thread:$0]  (!%p1286_p4), %s235_s11, 1024, %s237_s14, %s1291_s15, %s1175_s9, %s1533_s30, %s1534_s10  }
  0x28   : > { %p271_p1 = scmp.lt.s32.totalorder %s1172_s28, 5  ;;  %s1310_s16 = sadd.s32 4294967295, %s1172_s28  }
  0x29   : > { %s732_s17 = sadd.s32 4294967294, %s1172_s28   ;;  %s33_s6 = sadd.s32 1, %s1164_s26 }
  0x2a   : > { %p1305_p3 = pnand %p742_p13, %p271_p1  ;;  %p34_p6 = scmp.ge.s32.totalorder %s33_s6, 2 }
  0x2b   : > { %s36_s7 = sadd.s32 1, %s1168_s27  ;;  %s43_s11 = sadd.s32 1, %s1152_s23 }
  0x2c   : > { %p50_p7 = scmp.ne.s32.totalorder %s1152_s23, %s1148_s22  ;;  %s1590_s6 = smov (%p34_p6, %s33_s6), 0 }
  0x2d   : > { %1553 = sst [smem:[#allocation15_spill]] %s1590_s6  ;;  %s1592_s7 = smov (!%p34_p6, %s36_s7), %s1168_s27 }
  0x2e   : > { %p1326_p8 = por %p51_p0, %p50_p7  ;;  %p56_p9 = scmp.ne.s32.totalorder %s1148_s22, %s1144_s21 }
  0x2f   : > { %p38_p10 = scmp.ge.s32.totalorder %s1592_s7, 2  ;;  %p57_p11 = scmp.eq.s32.totalorder %s1310_s16, 0 }
  0x30   : > { %s66_s9 = ssub.s32 %s1164_s26, %s1590_s6  ;;  %p82_p12 = scmp.ne.s32.totalorder %s1136_s19, %s1132_s18 }
  0x31   : > { %s1594_s7 = smov (%p38_p10, %s1592_s7), 0  ;;  %p1342_p13 = por %p57_p11, %p56_p9 }
  0x32   : > { %1555 = sst [smem:[#allocation16_spill]] %s1594_s7  ;;  %p67_p0 = scmp.eq.s32.totalorder %s66_s9, 0 }
  0x33   : > { %s40_s10 = ssub.s32 %s1168_s27, %s1594_s7  ;;  %p1348_p1 = por %p82_p12, %p57_p11 }
  0x34   : > { %p41_p6 = scmp.eq.s32.totalorder %s40_s10, 0  ;;  %p179_p5 = scmp.eq.s32.totalorder %s1310_s16, 3 }
  0x35   : > { %s1558_s1 = sadd.s32 1, %s1140_s20  ;;  %p185_p2 = scmp.eq.s32.totalorder %s732_s17, 3 }
  0x36   : > { %s1356_s18 = scalar_select %p67_p0, %s1140_s20, %s1558_s1  }
  0x37   : > { %s1359_s6 = scalar_select %p41_p6, %s1152_s23, %s43_s11  }
  0x38   : > { %1559 = sst [smem:[#allocation17_spill]] %s1356_s18  ;;  %p1364_p10 = por %p179_p5, %p50_p7 }
  0x39   : > { %1560 = sst [smem:[#allocation18_spill]] %s1359_s6  ;;  %s208_s25 = sand.u32 1, %s1152_s23  }
  0x3a   : > { %s736_s9 = sshll.u32 %s1168_s27, 6  ;;  %p1373_p11 = por %p185_p2, %p56_p9 }
  0x3b   : > { %s735_s10 = sshll.u32 %s208_s25, 2  ;;  %s1563_s0 = sld [smem:[#allocation19_spill]] }
  0x3c   : > { %s1562_s7 = scalar_select %p1373_p11, 1, 0 }
  0x3d   : > { %p1564_p12 = scmp.lt.s32.totalorder %s1172_s28, 4  ;;  %s212_s17 = scalar_lea.vmem [#allocation2], %s735_s10 }
  0x3e   : > { %s219_s6 = sshll.u32 %s212_s17, 4  ;;  %s209_s27 = scalar_lea.sflag [#allocation3], %s208_s25  ;;  %s220_s6 = int_to_ptr.vmem [resolvable:$true] %s219_s6 }
  0x3f   : > { %p1384_p0 = pnand %p1564_p12, %p1326_p8  ;;  %s1005_s23 = scalar_lea.vmem %s220_s6, 64 }
  0x40   : > { %p1006_p5 = scmp.ne.s32.totalorder %s220_s6, %s1005_s23  ;;  %s1178_s18 = smov [#allocation2]  }
  0x41   : > { %s217_s1 = scalar_lea.hbm %s1563_s0, %s736_s9  ;;  %p994_p2 = pneg %p1384_p0 }
  0x42   : > { %s1010_s2 = sshll.u32 %s1178_s18, 4  ;;  %s1011_s2 = int_to_ptr.vmem [resolvable:$false] %s1010_s2 }
  0x43   : > { %p1008_p7 = pnand %p1006_p5, %p994_p2  ;;  %s1012_s4 = scalar_lea.vmem %s1011_s2, 128 }
  0x44   : > { %p1013_p6 = scmp.lt.s32.totalorder %s220_s6, %s1011_s2  ;;  %p1014_p8 = scmp.lt.s32.totalorder %s1012_s4, %s1005_s23 }
  0x45   : > { %p1009_p9 = pneg %p1008_p7 }
  0x46   : > { %p1015_p12 = por %p1014_p8, %p1013_p6 }
  0x48   : > { %p1016_p11 = pnand %p1015_p12, %p1009_p9 }
  0x4a   : > { %1019 = shalt.err (!%p1016_p11)
}
  0x4b   : > { %841 = dma.hbm_to_vmem [thread:$0]  (!%p1384_p0), %s217_s1, 64, %s220_s6, %s209_s27  }
  0x4c   : > { %s771_s25 = sshll.u32 %s1164_s26, 10  ;;  %s256_s14 = scalar_lea.vmem [#allocation7], %s1279_s8 }
  0x4d   : > { %s263_s9 = sshll.u32 %s256_s14, 4  ;;  %s262_s18 = scalar_lea.hbm %s1530_s3, %s771_s25  ;;  %s264_s9 = int_to_ptr.vmem [resolvable:$true] %s263_s9 }
  0x4e   : > { %s1033_s0 = scalar_lea.vmem %s264_s9, 1024  ;;  %p1566_p5 = pneg %p1286_p4 }
  0x4f   : > { %p1034_p2 = scmp.ne.s32.totalorder %s264_s9, %s1033_s0  ;;  %s1179_s23 = smov [#allocation7]  }
  0x50   : > { %s1038_s11 = sshll.u32 %s1179_s23, 4  ;;  %s1039_s11 = int_to_ptr.vmem [resolvable:$false] %s1038_s11 }
  0x51   : > { %p1036_p7 = pnand %p1034_p2, %p1566_p5  ;;  %s1040_s2 = scalar_lea.vmem %s1039_s11, 2048 }
  0x52   : > { %p1041_p9 = scmp.lt.s32.totalorder %s264_s9, %s1039_s11  ;;  %p1042_p0 = scmp.lt.s32.totalorder %s1040_s2, %s1033_s0 }
  0x53   : > { %p1037_p11 = pneg %p1036_p7 }
  0x54   : > { %p1043_p6 = por %p1042_p0, %p1041_p9 }
  0x56   : > { %p1044_p8 = pnand %p1043_p6, %p1037_p11 }
  0x58   : > { %1047 = shalt.err (!%p1044_p8)
}
  0x59   : > { %s1567_s27 = smov 4   ;;  %s1568_s8 = smov 64  }
  0x5a   : > { %847 = dma.hbm_to_vmem [thread:$0]  (!%p1286_p4), %s262_s18, 1024, %s264_s9, %s1291_s15, %s1568_s8, %s1568_s8, %s1567_s27  }
  0x5b   : > { %275 = sbr.rel (%p1305_p3) target bundleno = 575 (0x23f), region = 40  ;;  %s1409_s6 = sand.u32 (!%p1305_p3), 1, %s1148_s22  }
  0x5c   : > { %s743_s0 = sshll.u32 (!%p1305_p3), %s1409_s6, 2  ;;  %s278_s1 = scalar_lea.sflag (!%p1305_p3), [#allocation3], %s1409_s6 }
  0x5d   : > { %s1413_s4 = scalar_lea.vmem (!%p1305_p3), [#allocation2], %s743_s0 }
  0x60   : > { %1119 = dma.done.wait (%p1342_p13), %s278_s1, 64  }
  0x61   : > { %1121 = vsyncadd (%p1342_p13), %s278_s1, 4294967232  ;;  %s286_s12 = sand.u32 1, %s1310_s16   ;;  %s288_s15 = sand.u32 1, %s1136_s19  }
  0x62   : > { %s744_s13 = sshll.u32 %s288_s15, 6  ;;  %s287_s25 = scalar_lea.sflag [#allocation6], %s286_s12 }
  0x63   : > { %s1421_s14 = scalar_lea.vmem [#allocation5], %s744_s13 }
  0x64   : > { %1123 = dma.done.wait (%p1348_p1), %s287_s25, 2048  }
  0x65   : > { %1125 = vsyncadd (%p1348_p1), %s287_s25, 4294965248  ;;  %s746_s9 = sshll.u32 %s1409_s6, 3  ;;  %p339_p4 = scmp.lt.s32.totalorder %s1156_s24, 1 }
  0x66   : > { %s1569_s17 = sld [smem:[#allocation21_spill]]  ;;  %s1436_s23 = scalar_lea.vmem [#allocation7], %s744_s13 }
  0x67   : > { %s1430_s30 = scalar_select %p339_p4, %s1156_s24, 1 }
  0x68   : > { %s1438_s11 = scalar_lea.vmem [#allocation8], %s746_s9  ;;  %p747_p3 = scmp.ne.s32.totalorder %s1156_s24, 0 }
  0x6a   : > { %347 = sbr.rel (%p747_p3) target bundleno = 113 (0x71), region = 56 }
  0x6c   : > { %s341_s18 = scalar_lea.vmem %s1569_s17, %s1430_s30 }
  0x6f   : > { %v1180_v0 = vmov 0.0  }
  0x70   : > { %348 = vst [vmem:[%s1438_s11] sm:$0xff] %v1180_v0 }
  0x71 PF: > { %v948_v1 = vld [vmem:[%s1421_s14 + $0x38] sm:$0xff]   ;;  %v1181_v2 = vmov 0.0   ;;  %v949_v3 = vld [vmem:[%s1421_s14 + $0x30] sm:$0xff]   ;;  %vm1182_vm0 = vmmov 0   ;;  %v950_v4 = vld [vmem:[%s1421_s14 + $0x28] sm:$0xff]   ;;  %p765_p13 = scmp.ne.s32.totalorder %s1156_s24, 1 }
  0x72   : > { %790 = vmatprep.subr.bf16.mxu0 %v1181_v2  ;;  %810 = vmatprep.subr.bf16.mxu1 %v1181_v2  ;;  %v956_v5 = vld [vmem:[%s1436_s23 + $0x38] sm:$0xff]   ;;  %v951_v6 = vld [vmem:[%s1421_s14 + $0x20] sm:$0xff]   ;;  %v957_v7 = vld [vmem:[%s1436_s23 + $0x30] sm:$0xff]   ;;  %s1571_s1 = sld [smem:[#allocation22_spill]] (!%p765_p13) }
  0x73   : > { %791 = vmatpush3.bf16.msra.mxu0 %v948_v1  ;;  %806 = vmatprep.mubr.msk.bf16.mxu0 %vm1182_vm0, %v1181_v2  ;;  %v952_v8 = vld [vmem:[%s1421_s14 + $0x18] sm:$0xff]   ;;  %v958_v9 = vld [vmem:[%s1436_s23 + $0x28] sm:$0xff]   ;;  %v953_v10 = vld [vmem:[%s1421_s14 + $0x10] sm:$0xff]  }
  0x74   : > { %792 = vmatprep.subr.bf16.mxu0 %v1181_v2  ;;  %826 = vmatprep.mubr.msk.bf16.mxu1 %vm1182_vm0, %v1181_v2  ;;  %v959_v11 = vld [vmem:[%s1436_s23 + $0x20] sm:$0xff]   ;;  %v954_v12 = vld [vmem:[%s1421_s14 + $0x8] sm:$0xff]   ;;  %v960_v13 = vld [vmem:[%s1436_s23 + $0x18] sm:$0xff]  }
  0x75   : > { %811 = vmatpush3.bf16.msra.mxu1 %v956_v5  ;;  %v955_v14 = vld [vmem:[%s1421_s14] sm:$0xff]   ;;  %v961_v15 = vld [vmem:[%s1436_s23 + $0x10] sm:$0xff]   ;;  %v349_v16 = vld [vmem:[%s1413_s4] sm:$0xf] }
  0x76   : > { %812 = vmatprep.subr.bf16.mxu1 %v1181_v2  ;;  %v962_v17 = vld [vmem:[%s1436_s23 + $0x8] sm:$0xff]   ;;  %v963_v18 = vld [vmem:[%s1436_s23] sm:$0xff]   ;;  %v748_v19 = vld [vmem:[%s341_s18] ss:$0 sm:$0xff] }
  0x77   : > { %793 = vmatpush3.bf16.msra.mxu0 %v949_v3  ;;  %v462_v27 = vld [vmem:[%s1438_s11] sm:$0xff] }
  0x78   : > { %794 = vmatprep.subr.bf16.mxu0 %v1181_v2 }
  0x79   : > { %813 = vmatpush3.bf16.msra.mxu1 %v957_v7 }
  0x7a   : > { %814 = vmatprep.subr.bf16.mxu1 %v1181_v2 }
  0x7b   : > { %795 = vmatpush3.bf16.msra.mxu0 %v950_v4 }
  0x7c   : > { %796 = vmatprep.subr.bf16.mxu0 %v1181_v2 }
  0x7d   : > { %815 = vmatpush3.bf16.msra.mxu1 %v958_v9 }
  0x7e   : > { %816 = vmatprep.subr.bf16.mxu1 %v1181_v2 }
  0x7f   : > { %797 = vmatpush3.bf16.msra.mxu0 %v951_v6 }
  0x80   : > { %798 = vmatprep.subr.bf16.mxu0 %v1181_v2 }
  0x81   : > { %817 = vmatpush3.bf16.msra.mxu1 %v959_v11 }
  0x82   : > { %818 = vmatprep.subr.bf16.mxu1 %v1181_v2 }
  0x83   : > { %799 = vmatpush3.bf16.msra.mxu0 %v952_v8 }
  0x84   : > { %800 = vmatprep.subr.bf16.mxu0 %v1181_v2 }
  0x85   : > { %819 = vmatpush3.bf16.msra.mxu1 %v960_v13 }
  0x86   : > { %820 = vmatprep.subr.bf16.mxu1 %v1181_v2 }
  0x87   : > { %801 = vmatpush3.bf16.msra.mxu0 %v953_v10 }
  0x88   : > { %802 = vmatprep.subr.bf16.mxu0 %v1181_v2 }
  0x89   : > { %821 = vmatpush3.bf16.msra.mxu1 %v961_v15 }
  0x8a   : > { %822 = vmatprep.subr.bf16.mxu1 %v1181_v2 }
  0x8b   : > { %803 = vmatpush3.bf16.msra.mxu0 %v954_v12 }
  0x8c   : > { %804 = vmatprep.subr.bf16.mxu0 %v1181_v2 }
  0x8d   : > { %823 = vmatpush3.bf16.msra.mxu1 %v962_v17 }
  0x8e   : > { %824 = vmatprep.subr.bf16.mxu1 %v1181_v2 }
  0x8f   : > { %805 = vmatpush3.bf16.msra.mxu0 %v955_v14 }
  0x91   : > { %825 = vmatpush3.bf16.msra.mxu1 %v963_v18 }
  0x92   : > { %807 = vmatmul.mubr.bf16.vlgmr.msra.gmra.mxu0 %v349_v16 }
 0x152   : > { %v455_v20 = vpop.f32.mrf.mxu0 }
 0x153   : > { %v456_v21 = vadd.f32 %v748_v19, %v455_v20 }
 0x154   : > { %v808_v22 = vpop.f32.mrf.mxu0 }
 0x155   : > { %v461_v23 = vmax.f32 %v456_v21, 0.0 }
 0x156   : > { %v458_v24 = vpop.f32.mrf.mxu0 }
 0x157   : > { %v463_v25 = vpack.c.bf16 %v461_v23, %v461_v23 }
 0x158   : > { %v809_v26 = vpop.f32.mrf.mxu0 }
 0x159   : > { %827 = vmatmul.mubr.bf16.vlgmr.msra.gmra.mxu1 %v463_v25 }
 0x219   : > { %v562_v28 = vpop.f32.mrf.mxu1 }
 0x21a   : > { %v568_v29 = vadd.f32 %v562_v28, %v462_v27 }
 0x21b   : > { %v828_v30 = vpop.f32.mrf.mxu1  ;;  %573 = sbr.rel (%p765_p13) target bundleno = 551 (0x227), region = 60 }
 0x21c   : > { %569 = vst [vmem:[%s1438_s11] sm:$0xff] %v568_v29 }
 0x21d   : > { %v565_v31 = vpop.f32.mrf.mxu1 }
 0x21f   : > { %v829_v32 = vpop.f32.mrf.mxu1 }
 0x220   : > { %v766_v34 = vld [vmem:[%s1571_s1] ss:$0 sm:$0xff] }
 0x223   : > { %v574_v33 = vld [vmem:[%s1438_s11] sm:$0xff] }
 0x224   : > { %v582_v35 = vadd.f32 %v766_v34, %v574_v33 }
 0x226   : > { %583 = vst [vmem:[%s1438_s11] sm:$0xff] %v582_v35 }
 0x227 PF: > { %s1572_s4 = sld [smem:[#allocation13_spill]]  ;;  %s598_s9 = sshll.u32 %s1438_s11, 4  ;;  %s599_s9 = int_to_ptr.vmem [resolvable:$true] %s598_s9 }
 0x228   : > { %s1573_s25 = sld [smem:[#allocation23_spill]]  ;;  %s585_s30 = scalar_lea.sflag [#allocation4], %s1409_s6 }
 0x229   : > { %s1048_s10 = scalar_lea.vmem %s599_s9, 128  ;;  %s1183_s16 = smov [#allocation8]  }
 0x22a   : > { %p1049_p1 = scmp.ne.s32.totalorder %s599_s9, %s1048_s10  ;;  %s1052_s17 = sshll.u32 %s1183_s16, 4  ;;  %s1053_s17 = int_to_ptr.vmem [resolvable:$false] %s1052_s17 }
 0x22b   : > { %s1054_s18 = scalar_lea.vmem %s1053_s17, 256  ;;  %p1055_p5 = scmp.lt.s32.totalorder %s599_s9, %s1053_s17 }
 0x22c   : > { %p1050_p12 = pnand %p1049_p1, %p1364_p10  ;;  %p1056_p7 = scmp.lt.s32.totalorder %s1054_s18, %s1048_s10 }
 0x22d   : > { %s768_s12 = sshll.u32 %s1572_s4, 7 }
 0x22e   : > { %s1574_s14 = smov %s1573_s25  ;;  %s596_s24 = scalar_lea.hbm %s1573_s25, %s768_s12 }
 0x22f   : > { %p1051_p2 = pneg %p1050_p12  ;;  %p1057_p11 = por %p1056_p7, %p1055_p5 }
 0x231   : > { %p1058_p9 = pnand %p1057_p11, %p1051_p2 }
 0x233   : > { %1061 = shalt.err (!%p1058_p9)
}
 0x234   : > { %s1062_s23 = scalar_lea.hbm %s596_s24, 128  ;;  %s1066_s29 = scalar_lea.hbm %s1574_s14, 256 }
 0x235   : > { %p1063_p0 = scmp.ne.s32.totalorder %s596_s24, %s1062_s23  ;;  %p1067_p4 = scmp.lt.s32.totalorder %s596_s24, %s1574_s14 }
 0x236   : > { %p1068_p3 = scmp.lt.s32.totalorder %s1066_s29, %s1062_s23 }
 0x237   : > { %p1064_p6 = pnand %p1063_p0, %p1364_p10 }
 0x238   : > { %p1069_p13 = por %p1068_p3, %p1067_p4 }
 0x239   : > { %p1065_p8 = pneg %p1064_p6 }
 0x23b   : > { %p1070_p1 = pnand %p1069_p13, %p1065_p8 }
 0x23d   : > { %1073 = shalt.err (!%p1070_p1)
}
 0x23e   : > { %836 = dma.vmem_to_hbm [thread:$0]  (%p1364_p10), %s599_s9, 128, %s596_s24, %s585_s30  }
 0x23f PF: > { %p853_p12 = scmp.ge.s32.totalorder %s1172_s28, 2  ;;  %s610_s8 = sand.u32 1, %s1144_s21  }
 0x240   : > { %p1575_p2 = scmp.ne.s32.totalorder %s1562_s7, 0  ;;  %s611_s0 = scalar_lea.sflag [#allocation4], %s610_s8 }
 0x242   : > { %p849_p5 = pnand %p853_p12, %p1575_p2 }
 0x244   : > { %p850_p7 = pneg %p849_p5 }
 0x246   : > { %1127 = dma.done.wait (%p850_p7), %s611_s0, 128  }
 0x247   : > { %1129 = vsyncadd (%p850_p7), %s611_s0, 4294967168  ;;  %s24_s28 = sadd.s32 1, %s1172_s28   ;;  %s1576_s1 = sld [smem:[#allocation17_spill]] }
 0x248   : > { %p21_p11 = scmp.ge.s32.totalorder %s24_s28, 6   ;;  %s1577_s5 = sld [smem:[#allocation12_spill]] }
 0x249   : > { %s1578_s23 = sld [smem:[#allocation18_spill]]  ;;  %s1582_s18 = smov %s1136_s19 }
 0x24a   : > { %s1579_s25 = sld [smem:[#allocation14_spill]]  ;;  %s1583_s19 = smov %s1140_s20 }
 0x24b   : > { %s1580_s4 = sld [smem:[#allocation15_spill]]  ;;  %s1585_s21 = smov %s1148_s22 }
 0x24c   : > { %s1581_s27 = sld [smem:[#allocation16_spill]]  ;;  %s1587_s24 = smov %s1164_s26 }
 0x24d   : > { %s1584_s20 = smov %s1576_s1  ;;  %23 = sbr.rel (!%p21_p11) target bundleno = 17 (0x11), region = 120 }
 0x24e   : > { %s1586_s22 = smov %s1577_s5 }
 0x251   : > { %s1588_s26 = smov %s1580_s4 }
 0x252   :  { %616 = vsyncpa [#allocation3], 1 }
 0x253   :  { %618 = vsyncpa [#allocation3 + $0x1], 1 }
 0x254   :  { %619 = vsyncpa [#allocation6], 1 }
 0x255   :  { %621 = vsyncpa [#allocation6 + $0x1], 1 }
 0x256   :  { %622 = vsyncpa [#allocation4], 1 }
 0x257   :  { %624 = vsyncpa [#allocation4 + $0x1], 1 }

</bundles_post_ra>
